<compile_context>
chip_gen: v7x
topology: tpu7x:2x2x1
jax: 0.10.0
libtpu: 0.0.40
codegen_flags: <defaults>
</compile_context>

<pallas_src>
import functools
from typing import NamedTuple

import jax
import jax.numpy as jnp
from jax.experimental import pallas as pl
from jax.experimental.pallas import tpu as pltpu


_INV_SQRT2 = 0.7071067811865476  # 1/sqrt(2), for exact (erf) GELU


# --------------------------------------------------------------------------- #
# Kernels
# --------------------------------------------------------------------------- #
def _gelu_exact(h):
    # Exact (erf) GELU in f32 — matches torch.nn.GELU() default.
    # (On v5e a tanh approximation would move work from VALU to the idle EUP,
    #  but it changes numerics, so we keep erf.)
    return 0.5 * h * (1.0 + jax.lax.erf(h * _INV_SQRT2))


def _ffn_kernel_single(x_ref, w1_ref, b1_ref, w2_ref, b2_ref, o_ref):
    # Whole hidden dim resident in VMEM: one step, no accumulator needed.
    h = jnp.dot(x_ref[...], w1_ref[...], preferred_element_type=jnp.float32)
    h = _gelu_exact(h + b1_ref[...].astype(jnp.float32))
    # Dropout: inference mode (identity).
    # TODO(synk): training-mode dropout would use pltpu.prng_seed + pltpu.stateful_bernoulli.
    out = jnp.dot(h.astype(w2_ref.dtype), w2_ref[...],
                  preferred_element_type=jnp.float32)
    o_ref[...] = (out + b2_ref[...].astype(jnp.float32)).astype(o_ref.dtype)


def _ffn_kernel_ktiled_f32(x_ref, w1_ref, b1_ref, w2_ref, b2_ref, o_ref):
    # K-tiled, float32 output: accumulate straight into the resident o_ref
    # (output BlockSpec returns the same block for every k), no f32 scratch.
    k = pl.program_id(1)

    @pl.when(k == 0)
    def _():
        o_ref[...] = jnp.zeros_like(o_ref)

    h = jnp.dot(x_ref[...], w1_ref[...], preferred_element_type=jnp.float32)
    h = _gelu_exact(h + b1_ref[...].astype(jnp.float32))
    # Dropout: inference mode (identity).
    o_ref[...] += jnp.dot(h.astype(w2_ref.dtype), w2_ref[...],
                          preferred_element_type=jnp.float32)

    @pl.when(k == pl.num_programs(1) - 1)
    def _():
        o_ref[...] += b2_ref[...].astype(jnp.float32)


def _ffn_kernel_ktiled_acc(x_ref, w1_ref, b1_ref, w2_ref, b2_ref, o_ref, acc_ref):
    # K-tiled, low-precision output: f32 VMEM scratch accumulator, cast at the end.
    k = pl.program_id(1)

    @pl.when(k == 0)
    def _():
        acc_ref[...] = jnp.zeros_like(acc_ref)

    h = jnp.dot(x_ref[...], w1_ref[...], preferred_element_type=jnp.float32)
    h = _gelu_exact(h + b1_ref[...].astype(jnp.float32))
    # Dropout: inference mode (identity).
    acc_ref[...] += jnp.dot(h.astype(w2_ref.dtype), w2_ref[...],
                            preferred_element_type=jnp.float32)

    @pl.when(k == pl.num_programs(1) - 1)
    def _():
        o_ref[...] = (acc_ref[...] + b2_ref[...].astype(jnp.float32)).astype(o_ref.dtype)


# --------------------------------------------------------------------------- #
# Planning / parameter preparation (one-time, off the per-call critical path)
# --------------------------------------------------------------------------- #
def _round_up(x, m):
    return (x + m - 1) // m * m


def _sublane_multiple(dtype):
    # 8 for f32, 16 for bf16, 32 for int8/fp8 (sub-32-bit packs along sublanes).
    return max(8, 32 // jnp.dtype(dtype).itemsize)


def _vmem_capacity_bytes():
    try:
        info = pltpu.get_tpu_info()
        cap = int(getattr(info, "vmem_capacity_bytes", 0) or 0)
        if cap > 0:
            return cap
    except Exception:
        pass
    try:
        kind = jax.devices()[0].device_kind.lower()
        if "v7" in kind:
            return 64 * 1024 * 1024
        if any(v in kind for v in ("v4", "v5", "v6")):
            return 128 * 1024 * 1024
    except Exception:
        pass
    return 64 * 1024 * 1024  # conservative: v7x per-TensorCore VMEM


class FFNParams(NamedTuple):
    w1_t: jax.Array  # (dim, mlp_pad)
    b1_r: jax.Array  # (1, mlp_pad)
    w2_t: jax.Array  # (mlp_pad, dim)
    b2_r: jax.Array  # (1, dim)


class FFNPlan(NamedTuple):
    tm: int                 # row-tile target
    tk: int                 # hidden-dim tile (== mlp_pad means single k step)
    vmem_limit_bytes: int


def prepare_ffn_params(w1, b1, w2, b2, *, x_dtype=None, tm=512, tk=None):
    """One-time weight prep + tile planning.

    Accepts the torch nn.Linear layouts: w1 (mlp_dim, dim), b1 (mlp_dim,),
    w2 (dim, mlp_dim), b2 (dim,). Returns (FFNParams, FFNPlan). Call once and
    reuse — the transpose/pad is intentionally NOT in the per-call path.
    """
    w1 = jnp.asarray(w1); b1 = jnp.asarray(b1)
    w2 = jnp.asarray(w2); b2 = jnp.asarray(b2)
    mlp_dim, dim = w1.shape
    x_dtype = jnp.dtype(x_dtype if x_dtype is not None else w1.dtype)
    itw = jnp.dtype(w1.dtype).itemsize
    itx = x_dtype.itemsize
    use_scratch = x_dtype != jnp.dtype(jnp.float32)

    budget = int(0.85 * _vmem_capacity_bytes())

    def step_bytes(tm_, tk_):
        b = 2 * tm_ * dim * itx                 # x tile, double-buffered
        b += 2 * dim * tk_ * itw                # w1 tile
        b += 2 * max(tk_, 128) * itw            # b1 tile
        b += 2 * tk_ * dim * itw                # w2 tile
        b += 2 * max(dim, 128) * itw            # b2
        b += 2 * tm_ * dim * itx                # out tile
        if use_scratch and tk_ < mlp_dim:
            b += tm_ * dim * 4                  # f32 accumulator scratch
        return b + (2 << 20)                    # slack for compiler internals

    if tk is not None and tk < mlp_dim:
        tk = _round_up(tk, 128)                 # streamed k tiles must be lane-aligned

    tm_plan = tk_eff = None
    for tm_cand in [t for t in (tm, 256, 128, 64, 32, 16, 8) if t <= tm]:
        if tk is None:
            # Prefer single k step (weights resident, DMA'd once for the grid),
            # then the largest streamed tile that fits the VMEM budget.
            tk_cands = [mlp_dim] + [t for t in (2048, 1024, 512, 256, 128) if t < mlp_dim]
        else:
            tk_cands = [min(tk, mlp_dim)]
        for tk_cand in tk_cands:
            if step_bytes(tm_cand, tk_cand) <= budget:
                tm_plan, tk_eff = tm_cand, tk_cand
                break
        if tm_plan is not None:
            break
    if tm_plan is None:  # pathological sizes: best effort, let Mosaic decide
        tm_plan = 8
        tk_eff = min(tk or 128, mlp_dim)

    mlp_pad = mlp_dim if tk_eff >= mlp_dim else _round_up(mlp_dim, tk_eff)

    w1_t = w1.T                       # (dim, mlp_dim)
    w2_t = w2.T                       # (mlp_dim, dim)
    b1_r = b1.reshape(1, mlp_dim)
    b2_r = b2.reshape(1, dim)
    if mlp_pad != mlp_dim:
        # Padded hidden units are zero: gelu(0) = 0 -> zero output contribution.
        pad = mlp_pad - mlp_dim
        w1_t = jnp.pad(w1_t, ((0, 0), (0, pad)))
        b1_r = jnp.pad(b1_r, ((0, 0), (0, pad)))
        w2_t = jnp.pad(w2_t, ((0, pad), (0, 0)))

    return (FFNParams(w1_t, b1_r, w2_t, b2_r),
            FFNPlan(tm=int(tm_plan), tk=int(tk_eff), vmem_limit_bytes=int(budget)))


# --------------------------------------------------------------------------- #
# Forward pass
# --------------------------------------------------------------------------- #
@functools.partial(jax.jit, static_argnames=("tm", "tk", "vmem_limit_bytes"))
def _feed_forward_impl(x, w1_t, b1_r, w2_t, b2_r, *, tm, tk, vmem_limit_bytes):
    orig_shape = x.shape
    dim = orig_shape[-1]
    mlp_pad = w1_t.shape[1]
    out_dtype = x.dtype

    xf = x.reshape(-1, dim)
    n = xf.shape[0]

    # Row tiling: round to the dtype's sublane packing, clamp to the row count.
    sub = _sublane_multiple(x.dtype)
    tm_eff = _round_up(min(tm, _round_up(n, sub)), sub)
    # If a single tile would cover a large n, split into >=2 row tiles so the
    # "parallel" axis can shard across v7x's two TensorCores (harmless on 1 TC).
    if n > 256 and _round_up(n, tm_eff) // tm_eff == 1:
        tm_eff = _round_up(-(-n // 2), sub)
    n_pad = _round_up(n, tm_eff)
    if n_pad != n:
        # NOTE: padded rows compute gelu(b1) garbage; they are sliced off below.
        xf = jnp.pad(xf, ((0, n_pad - n), (0, 0)))

    grid_i = n_pad // tm_eff
    if tk >= mlp_pad:
        grid_k, tk_eff = 1, mlp_pad
    else:
        grid_k, tk_eff = mlp_pad // tk, tk

    itx = jnp.dtype(x.dtype).itemsize
    itw = jnp.dtype(w1_t.dtype).itemsize
    cost = pl.CostEstimate(
        flops=4 * n_pad * dim * mlp_pad,          # two matmuls
        transcendentals=n_pad * mlp_pad,          # erf
        bytes_accessed=int(xf.size * itx + w1_t.size * itw + w2_t.size * itw
                           + b1_r.size * itw + b2_r.size * itw + n_pad * dim * itx),
    )

    if grid_k == 1:
        # Weights have constant block indices -> DMA'd into VMEM once for the
        # whole grid; every row tile is pure compute.
        grid_spec = pltpu.PrefetchScalarGridSpec(
            num_scalar_prefetch=0,
            grid=(grid_i,),
            in_specs=[
                pl.BlockSpec((tm_eff, dim), lambda i: (i, 0)),
                pl.BlockSpec((dim, tk_eff), lambda i: (0, 0)),
                pl.BlockSpec((1, tk_eff), lambda i: (0, 0)),
                pl.BlockSpec((tk_eff, dim), lambda i: (0, 0)),
                pl.BlockSpec((1, dim), lambda i: (0, 0)),
            ],
            out_specs=pl.BlockSpec((tm_eff, dim), lambda i: (i, 0)),
            scratch_shapes=[],
        )
        kernel = _ffn_kernel_single
        dims = ("parallel",)
    else:
        f32_out = jnp.dtype(out_dtype) == jnp.dtype(jnp.float32)
        scratch = [] if f32_out else [pltpu.VMEM((tm_eff, dim), jnp.float32)]
        grid_spec = pltpu.PrefetchScalarGridSpec(
            num_scalar_prefetch=0,
            grid=(grid_i, grid_k),
            in_specs=[
                pl.BlockSpec((tm_eff, dim), lambda i, k: (i, 0)),
                pl.BlockSpec((dim, tk_eff), lambda i, k: (0, k)),
                pl.BlockSpec((1, tk_eff), lambda i, k: (0, k)),
                pl.BlockSpec((tk_eff, dim), lambda i, k: (k, 0)),
                pl.BlockSpec((1, dim), lambda i, k: (0, 0)),
            ],
            out_specs=pl.BlockSpec((tm_eff, dim), lambda i, k: (i, 0)),
            scratch_shapes=scratch,
        )
        kernel = _ffn_kernel_ktiled_f32 if f32_out else _ffn_kernel_ktiled_acc
        dims = ("parallel", "arbitrary")

    out = pl.pallas_call(
        kernel,
        out_shape=jax.ShapeDtypeStruct((n_pad, dim), out_dtype),
        grid_spec=grid_spec,
        compiler_params=pltpu.CompilerParams(
            dimension_semantics=dims,
            vmem_limit_bytes=vmem_limit_bytes,
        ),
        cost_estimate=cost,
    )(xf, w1_t, b1_r, w2_t, b2_r)

    return out[:n].reshape(orig_shape)


def feed_forward(x, params: FFNParams, plan: FFNPlan):
    """FeedForward forward pass (eval mode): w_2(dropout(gelu(w_1(x))))."""
    return _feed_forward_impl(x, params.w1_t, params.b1_r, params.w2_t, params.b2_r,
                              tm=plan.tm, tk=plan.tk,
                              vmem_limit_bytes=plan.vmem_limit_bytes)


# --------------------------------------------------------------------------- #
# Reference + test
# --------------------------------------------------------------------------- #
def _reference(x, w1, b1, w2, b2):
    h = x @ w1.T + b1
    h = jax.nn.gelu(h, approximate=False)
    return h @ w2.T + b2


def _make_params(key, dim, mlp_dim, dtype=jnp.float32):
    k1, k2, k3, k4 = jax.random.split(key, 4)
    lim1 = 1.0 / jnp.sqrt(dim)
    lim2 = 1.0 / jnp.sqrt(mlp_dim)
    w1 = jax.random.uniform(k1, (mlp_dim, dim), minval=-lim1, maxval=lim1, dtype=dtype)
    b1 = jax.random.uniform(k2, (mlp_dim,), minval=-lim1, maxval=lim1, dtype=dtype)
    w2 = jax.random.uniform(k3, (dim, mlp_dim), minval=-lim2, maxval=lim2, dtype=dtype)
    b2 = jax.random.uniform(k4, (dim,), minval=-lim2, maxval=lim2, dtype=dtype)
    return w1, b1, w2, b2


if __name__ == "__main__":
    key = jax.random.PRNGKey(0)

    # Test 1: small shapes matching the module (batch=2, seq=8, dim=32, mlp_dim=64).
    # Weights fit VMEM easily -> single-k, weights-resident kernel.
    batch, seq, dim, mlp_dim = 2, 8, 32, 64
    kx, kp = jax.random.split(key)
    x = jax.random.normal(kx, (batch, seq, dim), dtype=jnp.float32)
    w1, b1, w2, b2 = _make_params(kp, dim, mlp_dim)
    params, plan = prepare_ffn_params(w1, b1, w2, b2, x_dtype=jnp.float32)
    y = feed_forward(x, params, plan)
    jax.block_until_ready(y)
    y_ref = _reference(x, w1, b1, w2, b2)
    assert y.shape == x.shape
    assert jnp.allclose(y, y_ref, atol=1e-5, rtol=1e-5), "mismatch vs reference (single-k)"

    # Test 2: force k-tiling (3 k-steps) -> f32 accumulate-into-output path.
    batch2, seq2, dim2, mlp_dim2 = 3, 16, 128, 384
    kx2, kp2 = jax.random.split(kp)
    x2 = jax.random.normal(kx2, (batch2, seq2, dim2), dtype=jnp.float32)
    w1b, b1b, w2b, b2b = _make_params(kp2, dim2, mlp_dim2)
    params2, plan2 = prepare_ffn_params(w1b, b1b, w2b, b2b, x_dtype=jnp.float32, tk=128)
    y2 = feed_forward(x2, params2, plan2)
    jax.block_until_ready(y2)
    y2_ref = _reference(x2, w1b, b1b, w2b, b2b)
    assert y2.shape == x2.shape
    assert jnp.allclose(y2, y2_ref, atol=1e-4, rtol=1e-4), "mismatch vs reference (k-tiled f32)"

    # Test 3: bf16 inputs/weights, k-tiled -> f32 scratch-accumulator path.
    xb = x2.astype(jnp.bfloat16)
    w1c, b1c, w2c, b2c = (a.astype(jnp.bfloat16) for a in (w1b, b1b, w2b, b2b))
    params3, plan3 = prepare_ffn_params(w1c, b1c, w2c, b2c, x_dtype=jnp.bfloat16, tk=128)
    y3 = feed_forward(xb, params3, plan3)
    jax.block_until_ready(y3)
    assert y3.shape == xb.shape and y3.dtype == jnp.bfloat16
    assert jnp.allclose(y3.astype(jnp.float32), y2_ref, atol=5e-2, rtol=5e-2), \
        "mismatch vs reference (k-tiled bf16)"

    print("KERNEL_OK")
</pallas_src>

<mosaic_0001>
module attributes {stable_mosaic.version = 11 : i64} {
  func.func @_ffn_kernel_single(%arg0: i32, %arg1: memref<16x32xf32, #tpu.memory_space<vmem>>, %arg2: memref<32x64xf32, #tpu.memory_space<vmem>>, %arg3: memref<1x64xf32, #tpu.memory_space<vmem>>, %arg4: memref<64x32xf32, #tpu.memory_space<vmem>>, %arg5: memref<1x32xf32, #tpu.memory_space<vmem>>, %arg6: memref<16x32xf32, #tpu.memory_space<vmem>>) attributes {dimension_semantics = [#tpu.dimension_semantics<parallel>], iteration_bounds = array<i64: 1>, scalar_prefetch = 0 : i64, scratch_operands = 0 : i64, tpu.core_type = #tpu.core_type<tc>, window_params = [{transform_indices = @transform_0, window_bounds = array<i64: 16, 32>}, {pipeline_mode = #tpu.pipeline_mode<synchronous>, transform_indices = @transform_1, window_bounds = array<i64: 32, 64>}, {pipeline_mode = #tpu.pipeline_mode<synchronous>, transform_indices = @transform_2, window_bounds = array<i64: 1, 64>}, {pipeline_mode = #tpu.pipeline_mode<synchronous>, transform_indices = @transform_3, window_bounds = array<i64: 64, 32>}, {pipeline_mode = #tpu.pipeline_mode<synchronous>, transform_indices = @transform_4, window_bounds = array<i64: 1, 32>}, {transform_indices = @transform_5, window_bounds = array<i64: 16, 32>}]} {
    %c0 = arith.constant 0 : index
    %c0_0 = arith.constant 0 : index
    %0 = vector.load %arg1[%c0, %c0_0] : memref<16x32xf32, #tpu.memory_space<vmem>>, vector<16x32xf32>
    %c0_1 = arith.constant 0 : index
    %c0_2 = arith.constant 0 : index
    %1 = vector.load %arg2[%c0_1, %c0_2] : memref<32x64xf32, #tpu.memory_space<vmem>>, vector<32x64xf32>
    %cst = arith.constant dense<0.000000e+00> : vector<16x64xf32>
    %2 = tpu.matmul %0, %1, %cst {dimension_numbers = #tpu.dot_dimension_numbers<[1], [0], [0], [1], [0, 0, 1, 1], [], []>} : vector<16x32xf32>, vector<32x64xf32>, vector<16x64xf32> -> vector<16x64xf32>
    %c0_3 = arith.constant 0 : index
    %c0_4 = arith.constant 0 : index
    %3 = vector.load %arg3[%c0_3, %c0_4] : memref<1x64xf32, #tpu.memory_space<vmem>>, vector<1x64xf32>
    %4 = vector.broadcast %3 : vector<1x64xf32> to vector<16x64xf32>
    %5 = arith.addf %2, %4 : vector<16x64xf32>
    %cst_5 = arith.constant 5.000000e-01 : f32
    %6 = vector.broadcast %cst_5 : f32 to vector<16x64xf32>
    %7 = arith.mulf %6, %5 : vector<16x64xf32>
    %cst_6 = arith.constant 0.707106769 : f32
    %8 = vector.broadcast %cst_6 : f32 to vector<16x64xf32>
    %9 = arith.mulf %5, %8 : vector<16x64xf32>
    %10 = math.erf %9 : vector<16x64xf32>
    %cst_7 = arith.constant 1.000000e+00 : f32
    %11 = vector.broadcast %cst_7 : f32 to vector<16x64xf32>
    %12 = arith.addf %11, %10 : vector<16x64xf32>
    %13 = arith.mulf %7, %12 : vector<16x64xf32>
    %c0_8 = arith.constant 0 : index
    %c0_9 = arith.constant 0 : index
    %14 = vector.load %arg4[%c0_8, %c0_9] : memref<64x32xf32, #tpu.memory_space<vmem>>, vector<64x32xf32>
    %cst_10 = arith.constant dense<0.000000e+00> : vector<16x32xf32>
    %15 = tpu.matmul %13, %14, %cst_10 {dimension_numbers = #tpu.dot_dimension_numbers<[1], [0], [0], [1], [0, 0, 1, 1], [], []>} : vector<16x64xf32>, vector<64x32xf32>, vector<16x32xf32> -> vector<16x32xf32>
    %c0_11 = arith.constant 0 : index
    %c0_12 = arith.constant 0 : index
    %16 = vector.load %arg5[%c0_11, %c0_12] : memref<1x32xf32, #tpu.memory_space<vmem>>, vector<1x32xf32>
    %17 = vector.broadcast %16 : vector<1x32xf32> to vector<16x32xf32>
    %18 = arith.addf %15, %17 : vector<16x32xf32>
    %c0_13 = arith.constant 0 : index
    %c0_14 = arith.constant 0 : index
    %19 = vector.load %arg6[%c0_13, %c0_14] : memref<16x32xf32, #tpu.memory_space<vmem>>, vector<16x32xf32>
    tpu.vector_store %arg6[%c0_13, %c0_14], %18 {strides = array<i32>} : memref<16x32xf32, #tpu.memory_space<vmem>>, vector<16x32xf32>,
    return
  }
  func.func @transform_0(%arg0: i32) -> (i32, i32) {
    %c0_i32 = arith.constant 0 : i32
    %c0_i32_0 = arith.constant 0 : i32
    return %arg0, %c0_i32 : i32, i32
  }
  func.func @transform_1(%arg0: i32) -> (i32, i32) {
    %c0_i32 = arith.constant 0 : i32
    %c0_i32_0 = arith.constant 0 : i32
    %c0_i32_1 = arith.constant 0 : i32
    return %c0_i32, %c0_i32_0 : i32, i32
  }
  func.func @transform_2(%arg0: i32) -> (i32, i32) {
    %c0_i32 = arith.constant 0 : i32
    %c0_i32_0 = arith.constant 0 : i32
    %c0_i32_1 = arith.constant 0 : i32
    return %c0_i32, %c0_i32_0 : i32, i32
  }
  func.func @transform_3(%arg0: i32) -> (i32, i32) {
    %c0_i32 = arith.constant 0 : i32
    %c0_i32_0 = arith.constant 0 : i32
    %c0_i32_1 = arith.constant 0 : i32
    return %c0_i32, %c0_i32_0 : i32, i32
  }
  func.func @transform_4(%arg0: i32) -> (i32, i32) {
    %c0_i32 = arith.constant 0 : i32
    %c0_i32_0 = arith.constant 0 : i32
    %c0_i32_1 = arith.constant 0 : i32
    return %c0_i32, %c0_i32_0 : i32, i32
  }
  func.func @transform_5(%arg0: i32) -> (i32, i32) {
    %c0_i32 = arith.constant 0 : i32
    %c0_i32_0 = arith.constant 0 : i32
    return %arg0, %c0_i32 : i32, i32
  }
}

</mosaic_0001>

<bundles_post_ra>
// kernel: _feed_forward_impl.1
= control target key start
LH: loop header
LB: loop body
LE: loop exit
PB: predicated region body
PF: predicated region fallthrough
CT: control target
= control target key end

     0   :  { %vm34_vm0 = vcmask 261120   ;;  %s445_s0 = inlined_call_operand.vmem [shape: f32[16,32], index: 0, kind: input, shape index: {}]   ;;  %s446_s1 = inlined_call_operand.vmem [shape: f32[32,64], index: 1, kind: input, shape index: {}]   ;;  %s447_s2 = inlined_call_operand.vmem [shape: f32[1,64], index: 2, kind: input, shape index: {}]   ;;  %s448_s3 = inlined_call_operand.vmem [shape: f32[64,32], index: 3, kind: input, shape index: {}]   ;;  %s449_s4 = inlined_call_operand.vmem [shape: f32[1,32], index: 4, kind: input, shape index: {}]   ;;  %s450_s5 = inlined_call_operand.hbm [shape: f32[16,32], index: 5, kind: output, shape index: {}]  }
   0x1   :  { %v23_v0 = vld [vmem:[%s446_s1] sm:$0xff]  ;;  %v24_v1 = vld [vmem:[%s446_s1 + $0x8] sm:$0xff]  ;;  %v25_v2 = vld [vmem:[%s446_s1 + $0x10] sm:$0xff] }
   0x2   :  { %v293_v3 = vpack.c.bf16 %v24_v1, %v23_v0  ;;  %v26_v4 = vld [vmem:[%s446_s1 + $0x18] sm:$0xff]  ;;  %v21_v5 = vld [vmem:[%s445_s0] sm:$0xff] }
   0x3   :  { %v297_v6 = vpack.c.bf16 %v26_v4, %v25_v2  ;;  %271 = vmatprep.mubr.msk.f32.mxu0 %vm34_vm0, %v21_v5 }
   0x4   :  { %10 = vsyncpa [#allocation3], 0  ;;  %294 = vmatprep.subr.bf16.mxu0 %v293_v3  ;;  %v22_v7 = vld [vmem:[%s445_s0 + $0x8] sm:$0xff]  ;;  %v126_v8 = vld [vmem:[%s448_s3] sm:$0xff]  ;;  %vm141_vm1 = vcmask 523264   ;;  %s348_s21 = smov [#allocation2]  }
   0x5   :  { %296 = vmatpush3.bf16.msra.mxu0 %v293_v3  ;;  %v127_v9 = vld [vmem:[%s448_s3 + $0x8] sm:$0xff]  ;;  %v128_v11 = vld [vmem:[%s448_s3 + $0x10] sm:$0xff]  ;;  %v129_v12 = vld [vmem:[%s448_s3 + $0x18] sm:$0xff]  ;;  %s230_s22 = sshll.u32 %s348_s21, 4  ;;  %s231_s22 = int_to_ptr.vmem [resolvable:$true] %s230_s22 }
   0x6   :  { %298 = vmatprep.subr.bf16.mxu0 %v297_v6  ;;  %v301_v10 = vpack.c.bf16 %v127_v9, %v126_v8  ;;  %v305_v13 = vpack.c.bf16 %v129_v12, %v128_v11  ;;  %v130_v14 = vld [vmem:[%s448_s3 + $0x20] sm:$0xff]  ;;  %v131_v15 = vld [vmem:[%s448_s3 + $0x28] sm:$0xff]  ;;  %v132_v17 = vld [vmem:[%s448_s3 + $0x30] sm:$0xff]  ;;  %s324_s23 = scalar_lea.vmem %s231_s22, 256  ;;  %p329_p1 = scmp.lt.s32.totalorder %s231_s22, %s231_s22 }
   0x7   :  { %v309_v16 = vpack.c.bf16 %v131_v15, %v130_v14  ;;  %v133_v18 = vld [vmem:[%s448_s3 + $0x38] sm:$0xff]  ;;  %v241_v20 = vld [vmem:[%s447_s2] ss:$0 sm:$0xff]  ;;  %p325_p0 = scmp.ne.s32.totalorder %s231_s22, %s324_s23  ;;  %p330_p2 = scmp.lt.s32.totalorder %s324_s23, %s324_s23 }
   0x8   :  { %302 = vmatprep.subr.bf16.mxu1 %v301_v10  ;;  %v313_v19 = vpack.c.bf16 %v133_v18, %v132_v17  ;;  %v244_v35 = vld [vmem:[%s449_s4] ss:$0 sm:$0xff] }
   0x9   :  { %300 = vmatpush3.bf16.msra.mxu0 %v297_v6  ;;  %304 = vmatpush3.bf16.msra.mxu1 %v301_v10  ;;  %p331_p3 = por %p330_p2, %p329_p1 }
   0xa   :  { %306 = vmatprep.subr.bf16.mxu1 %v305_v13 }
   0xb   :  { %p332_p4 = pnand %p331_p3, %p325_p0 }
   0xc   :  { %272 = vmatmul.mubr.msk.f32.vlgmr.msra.gmra.mrb[0].mxu0 %vm34_vm0, %v22_v7 }
   0xd   :  { %308 = vmatpush3.bf16.msra.mxu1 %v305_v13 }
   0xe   :  { %310 = vmatprep.subr.bf16.mxu1 %v309_v16 }
  0x11   :  { %312 = vmatpush3.bf16.msra.mxu1 %v309_v16 }
  0x12   :  { %314 = vmatprep.subr.bf16.mxu1 %v313_v19 }
  0x15   :  { %316 = vmatpush3.bf16.msra.mxu1 %v313_v19 }
  0xdf   :  { %v273_v21 = vpop.f32.mrb[0].mxu0 }
  0xe0   :  { %v113_v22 = vadd.f32 %v273_v21, %v241_v20  ;;  %v107_v23 = vpop.f32.mrb[1].mxu0 }
  0xe1   :  { %v108_v24 = vadd.f32 %v241_v20, %v107_v23 }
  0xe2   :  { %v119_v25 = vmul.f32 0.70710677, %v113_v22  ;;  %v117_v32 = vmul.f32 0.5, %v113_v22 }
  0xe3   :  { %v118_v26 = vmul.f32 0.70710677, %v108_v24  ;;  %v116_v30 = vmul.f32 0.5, %v108_v24 }
  0xe4   :  { %320 = verf.f32 %v119_v25 }
  0xe5   :  { %322 = verf.f32 %v118_v26 }
  0xee   :  { %v321_v27 = vpop.eup %320 }
  0xef   :  { %v323_v28 = vpop.eup %322  ;;  %v123_v29 = vadd.f32 1.0, %v321_v27 }
  0xf0   :  { %v122_v31 = vadd.f32 1.0, %v323_v28 }
  0xf1   :  { %v125_v34 = vmul.f32 %v123_v29, %v117_v32 }
  0xf2   :  { %v124_v33 = vmul.f32 %v122_v31, %v116_v30 }
  0xf4   :  { %290 = vmatprep.mubr.msk.f32.mxu1 %vm141_vm1, %v124_v33 }
  0xf5   :  { %291 = vmatmul.mubr.msk.f32.vlgmr.msra.gmra.mrb[0].mxu1 %vm141_vm1, %v125_v34 }
 0x1c8   :  { %v292_v36 = vpop.f32.mrb[0].mxu1 }
 0x1c9   :  { %v220_v37 = vadd.f32 %v292_v36, %v244_v35  ;;  %v214_v38 = vpop.f32.mrb[1].mxu1 }
 0x1ca   :  { %v215_v39 = vadd.f32 %v244_v35, %v214_v38 }
 0x1cb   :  { %224 = vst.msk [vmem:[#allocation2 + $0x8] sm:$0xff] %vm34_vm0, %v220_v37 }
 0x1cc   :  { %223 = vst.msk [vmem:[#allocation2] sm:$0xff] %vm34_vm0, %v215_v39 }
 0x1cd   :  { %335 = shalt.err (!%p332_p4)
}
 0x1ce   :  { %s336_s25 = scalar_lea.hbm %s450_s5, 256 }
 0x1cf   :  { %p337_p5 = scmp.ne.s32.totalorder %s450_s5, %s336_s25  ;;  %p340_p6 = scmp.lt.u32.totalorder %s336_s25, %s450_s5 }
 0x1d1   :  { %p342_p7 = pnand %p340_p6, %p337_p5 }
 0x1d3   :  { %345 = shalt.err (!%p342_p7)
}
 0x1d4   :  { %s349_s30 = smov 128   ;;  %s350_s1 = smov 8  }
 0x1d5   :  { %236 = dma.vmem_to_hbm [thread:$0]  %s231_s22, 256, %s450_s5, [#allocation3], %s349_s30, %s349_s30, %s350_s1  }
 0x1d6   :  { %346 = dma.done.wait [#allocation3], 256  }
 0x1d7   :  { %347 = vsyncadd [#allocation3], 4294967040 }
 0x1d8   :  { %240 = vsyncpa [#allocation3], 1 }

</bundles_post_ra>
